<compile_context>
chip_gen: v6e
topology: v6e:2x2x1
jax: 0.10.0
libtpu: 0.0.40
codegen_flags: <defaults>
</compile_context>

<pallas_src>
import functools

import jax
import jax.numpy as jnp
from jax.experimental import pallas as pl
from jax.experimental.pallas import tpu as pltpu

INPUT_SIZE = 13
HIDDEN_SIZE = 100
OUTPUT_SIZE = 12  # = hidden_size // 8 in the PyTorch module; explicit here.

DEFAULT_TILE = 4096          # batch rows per grid step (sweep 2048-8192)
ROW_CHUNK = 256              # rows per in-kernel chunk (bounds live ranges)
VMEM_LIMIT_BYTES = 32 * 1024 * 1024   # above v5e's 16 MiB default scoped VMEM


def _round_up(n: int, m: int) -> int:
    return (n + m - 1) // m * m


def _pick_tile(batch: int):
    """Return (batch_tile, row_chunk). batch_tile is a multiple of row_chunk."""
    b8 = _round_up(batch, 8)
    if b8 <= ROW_CHUNK:
        return b8, b8                      # single small chunk, single tile
    tb = min(_round_up(DEFAULT_TILE, ROW_CHUNK), _round_up(b8, ROW_CHUNK))
    # Keep >= 4 grid steps on large batches (megacore + pipeline priming).
    quarter = _round_up(pl.cdiv(b8, 4), ROW_CHUNK)
    tb = min(tb, max(quarter, ROW_CHUNK))
    return tb, ROW_CHUNK


def _mlp_rows(x_f32, w1, b1, w2, b2, w3, b3):
    """fc1+relu, fc2+relu, fc3 on a chunk of rows. bf16 in, f32 accumulate."""
    h1 = jnp.dot(x_f32.astype(jnp.bfloat16), w1,
                 preferred_element_type=jnp.float32)
    h1 = jnp.maximum(h1 + b1, 0.0)
    h2 = jnp.dot(h1.astype(jnp.bfloat16), w2,
                 preferred_element_type=jnp.float32)
    h2 = jnp.maximum(h2 + b2, 0.0)
    out = jnp.dot(h2.astype(jnp.bfloat16), w3,
                  preferred_element_type=jnp.float32)
    return out + b3


def _mlp_kernel(x_ref, w1_ref, b1_ref, w2_ref, b2_ref, w3_ref, b3_ref, o_ref,
                *, chunk: int):
    # Weights/biases are tiny and resident; read once per grid step.
    w1 = w1_ref[...]
    b1 = b1_ref[...]
    w2 = w2_ref[...]
    b2 = b2_ref[...]
    w3 = w3_ref[...]
    b3 = b3_ref[...]

    n_chunks = x_ref.shape[0] // chunk  # static
    if n_chunks == 1:
        o_ref[...] = _mlp_rows(x_ref[...], w1, b1, w2, b2, w3, b3
                               ).astype(o_ref.dtype)
    else:
        @pl.loop(0, n_chunks)
        def _(c):
            r = pl.multiple_of(c * chunk, chunk)
            out = _mlp_rows(x_ref[pl.ds(r, chunk), :], w1, b1, w2, b2, w3, b3)
            o_ref[pl.ds(r, chunk), :] = out.astype(o_ref.dtype)


@jax.jit
def neural_net_forward(x, w1, b1, w2, b2, w3, b3):
    """x: (batch, 13) f32. w*: bf16 (in,out). b*: f32 (1,out). Returns f32."""
    batch = x.shape[0]
    tb, chunk = _pick_tile(batch)
    n_tiles = pl.cdiv(batch, tb)

    layer_params = (INPUT_SIZE * HIDDEN_SIZE + HIDDEN_SIZE * OUTPUT_SIZE
                    + OUTPUT_SIZE * OUTPUT_SIZE)
    flops = 2 * batch * layer_params
    bytes_accessed = (batch * INPUT_SIZE * 4          # f32 x in
                      + batch * OUTPUT_SIZE * 4       # f32 out
                      + layer_params * 2              # bf16 weights
                      + (HIDDEN_SIZE + 2 * OUTPUT_SIZE) * 4)  # f32 biases

    resident = lambda arr: pl.BlockSpec(arr.shape, lambda i: (0, 0))

    return pl.pallas_call(
        functools.partial(_mlp_kernel, chunk=chunk),
        out_shape=jax.ShapeDtypeStruct((batch, OUTPUT_SIZE), jnp.float32),
        grid=(n_tiles,),
        in_specs=[
            pl.BlockSpec((tb, INPUT_SIZE), lambda i: (i, 0)),  # x: streamed
            resident(w1), resident(b1),                        # weights/biases
            resident(w2), resident(b2),                        # stay resident
            resident(w3), resident(b3),
        ],
        out_specs=pl.BlockSpec((tb, OUTPUT_SIZE), lambda i: (i, 0)),
        compiler_params=pltpu.CompilerParams(
            dimension_semantics=("parallel",),
            vmem_limit_bytes=VMEM_LIMIT_BYTES,
        ),
        cost_estimate=pl.CostEstimate(
            flops=flops, transcendentals=0, bytes_accessed=bytes_accessed),
    )(x, w1, b1, w2, b2, w3, b3)


def init_params(key):
    """nn.Linear-style init (uniform +-1/sqrt(fan_in)), f32.

    Weights stored (in_features, out_features); biases (1, out) so they
    broadcast against the (rows, out) matmul result in-kernel.
    """
    def linear(k, fan_in, fan_out):
        kw, kb = jax.random.split(k)
        bound = 1.0 / jnp.sqrt(fan_in)
        w = jax.random.uniform(kw, (fan_in, fan_out), jnp.float32, -bound, bound)
        b = jax.random.uniform(kb, (1, fan_out), jnp.float32, -bound, bound)
        return w, b

    k1, k2, k3 = jax.random.split(key, 3)
    w1, b1 = linear(k1, INPUT_SIZE, HIDDEN_SIZE)
    w2, b2 = linear(k2, HIDDEN_SIZE, OUTPUT_SIZE)
    w3, b3 = linear(k3, OUTPUT_SIZE, OUTPUT_SIZE)
    return w1, b1, w2, b2, w3, b3


def prepare_params(params):
    """One-time (outside jit) cast of weights to bf16; biases stay f32."""
    w1, b1, w2, b2, w3, b3 = params
    return (w1.astype(jnp.bfloat16), b1,
            w2.astype(jnp.bfloat16), b2,
            w3.astype(jnp.bfloat16), b3)


def reference_forward(x, w1, b1, w2, b2, w3, b3):
    """Pure-JAX reference mirroring the kernel's bf16-input / f32-acc math."""
    bf = lambda a: a.astype(jnp.bfloat16)
    h1 = jnp.maximum(
        jnp.dot(bf(x), bf(w1), preferred_element_type=jnp.float32) + b1, 0.0)
    h2 = jnp.maximum(
        jnp.dot(bf(h1), bf(w2), preferred_element_type=jnp.float32) + b2, 0.0)
    return jnp.dot(bf(h2), bf(w3), preferred_element_type=jnp.float32) + b3


if __name__ == "__main__":
    key = jax.random.PRNGKey(0)
    kx, kx2, kp = jax.random.split(key, 3)
    params_f32 = init_params(kp)
    params = prepare_params(params_f32)          # weights bf16, biases f32

    # Small single-tile check.
    batch = 8
    x = jax.random.normal(kx, (batch, INPUT_SIZE), jnp.float32)
    out = jax.block_until_ready(neural_net_forward(x, *params))
    ref = reference_forward(x, *params_f32)
    assert out.shape == (batch, OUTPUT_SIZE), out.shape
    assert jnp.allclose(out, ref, atol=1e-3, rtol=1e-3), \
        "mismatch vs reference (small)"

    # Ragged multi-tile check (grid > 1, masked trailing block, inner chunks).
    batch2 = 2600
    x2 = jax.random.normal(kx2, (batch2, INPUT_SIZE), jnp.float32)
    out2 = jax.block_until_ready(neural_net_forward(x2, *params))
    ref2 = reference_forward(x2, *params_f32)
    assert out2.shape == (batch2, OUTPUT_SIZE), out2.shape
    assert jnp.allclose(out2, ref2, atol=1e-3, rtol=1e-3), \
        "mismatch vs reference (tiled/ragged)"

    print("KERNEL_OK")
</pallas_src>

<mosaic_0001>
module attributes {stable_mosaic.version = 11 : i64} {
  func.func @_mlp_kernel(%arg0: i32, %arg1: memref<8x13xf32, #tpu.memory_space<vmem>>, %arg2: memref<13x100xbf16, #tpu.memory_space<vmem>>, %arg3: memref<1x100xf32, #tpu.memory_space<vmem>>, %arg4: memref<100x12xbf16, #tpu.memory_space<vmem>>, %arg5: memref<1x12xf32, #tpu.memory_space<vmem>>, %arg6: memref<12x12xbf16, #tpu.memory_space<vmem>>, %arg7: memref<1x12xf32, #tpu.memory_space<vmem>>, %arg8: memref<8x12xf32, #tpu.memory_space<vmem>>) attributes {dimension_semantics = [#tpu.dimension_semantics<parallel>], iteration_bounds = array<i64: 1>, scalar_prefetch = 0 : i64, scratch_operands = 0 : i64, tpu.core_type = #tpu.core_type<tc>, window_params = [{transform_indices = @transform_0, window_bounds = array<i64: 8, 13>}, {pipeline_mode = #tpu.pipeline_mode<synchronous>, transform_indices = @transform_1, window_bounds = array<i64: 13, 100>}, {pipeline_mode = #tpu.pipeline_mode<synchronous>, transform_indices = @transform_2, window_bounds = array<i64: 1, 100>}, {pipeline_mode = #tpu.pipeline_mode<synchronous>, transform_indices = @transform_3, window_bounds = array<i64: 100, 12>}, {pipeline_mode = #tpu.pipeline_mode<synchronous>, transform_indices = @transform_4, window_bounds = array<i64: 1, 12>}, {pipeline_mode = #tpu.pipeline_mode<synchronous>, transform_indices = @transform_5, window_bounds = array<i64: 12, 12>}, {pipeline_mode = #tpu.pipeline_mode<synchronous>, transform_indices = @transform_6, window_bounds = array<i64: 1, 12>}, {transform_indices = @transform_7, window_bounds = array<i64: 8, 12>}]} {
    %c0 = arith.constant 0 : index
    %c0_0 = arith.constant 0 : index
    %0 = vector.load %arg2[%c0, %c0_0] : memref<13x100xbf16, #tpu.memory_space<vmem>>, vector<13x100xbf16>
    %c0_1 = arith.constant 0 : index
    %c0_2 = arith.constant 0 : index
    %1 = vector.load %arg3[%c0_1, %c0_2] : memref<1x100xf32, #tpu.memory_space<vmem>>, vector<1x100xf32>
    %c0_3 = arith.constant 0 : index
    %c0_4 = arith.constant 0 : index
    %2 = vector.load %arg4[%c0_3, %c0_4] : memref<100x12xbf16, #tpu.memory_space<vmem>>, vector<100x12xbf16>
    %c0_5 = arith.constant 0 : index
    %c0_6 = arith.constant 0 : index
    %3 = vector.load %arg5[%c0_5, %c0_6] : memref<1x12xf32, #tpu.memory_space<vmem>>, vector<1x12xf32>
    %c0_7 = arith.constant 0 : index
    %c0_8 = arith.constant 0 : index
    %4 = vector.load %arg6[%c0_7, %c0_8] : memref<12x12xbf16, #tpu.memory_space<vmem>>, vector<12x12xbf16>
    %c0_9 = arith.constant 0 : index
    %c0_10 = arith.constant 0 : index
    %5 = vector.load %arg7[%c0_9, %c0_10] : memref<1x12xf32, #tpu.memory_space<vmem>>, vector<1x12xf32>
    %c0_11 = arith.constant 0 : index
    %c0_12 = arith.constant 0 : index
    %6 = vector.load %arg1[%c0_11, %c0_12] : memref<8x13xf32, #tpu.memory_space<vmem>>, vector<8x13xf32>
    %7 = arith.truncf %6 : vector<8x13xf32> to vector<8x13xbf16>
    %cst = arith.constant dense<0.000000e+00> : vector<8x100xf32>
    %8 = tpu.matmul %7, %0, %cst {dimension_numbers = #tpu.dot_dimension_numbers<[1], [0], [0], [1], [0, 0, 1, 1], [], []>} : vector<8x13xbf16>, vector<13x100xbf16>, vector<8x100xf32> -> vector<8x100xf32>
    %9 = vector.broadcast %1 : vector<1x100xf32> to vector<8x100xf32>
    %10 = arith.addf %8, %9 : vector<8x100xf32>
    %cst_13 = arith.constant 0.000000e+00 : f32
    %11 = vector.broadcast %cst_13 : f32 to vector<8x100xf32>
    %12 = arith.maximumf %10, %11 : vector<8x100xf32>
    %13 = arith.truncf %12 : vector<8x100xf32> to vector<8x100xbf16>
    %cst_14 = arith.constant dense<0.000000e+00> : vector<8x12xf32>
    %14 = tpu.matmul %13, %2, %cst_14 {dimension_numbers = #tpu.dot_dimension_numbers<[1], [0], [0], [1], [0, 0, 1, 1], [], []>} : vector<8x100xbf16>, vector<100x12xbf16>, vector<8x12xf32> -> vector<8x12xf32>
    %15 = vector.broadcast %3 : vector<1x12xf32> to vector<8x12xf32>
    %16 = arith.addf %14, %15 : vector<8x12xf32>
    %cst_15 = arith.constant 0.000000e+00 : f32
    %17 = vector.broadcast %cst_15 : f32 to vector<8x12xf32>
    %18 = arith.maximumf %16, %17 : vector<8x12xf32>
    %19 = arith.truncf %18 : vector<8x12xf32> to vector<8x12xbf16>
    %cst_16 = arith.constant dense<0.000000e+00> : vector<8x12xf32>
    %20 = tpu.matmul %19, %4, %cst_16 {dimension_numbers = #tpu.dot_dimension_numbers<[1], [0], [0], [1], [0, 0, 1, 1], [], []>} : vector<8x12xbf16>, vector<12x12xbf16>, vector<8x12xf32> -> vector<8x12xf32>
    %21 = vector.broadcast %5 : vector<1x12xf32> to vector<8x12xf32>
    %22 = arith.addf %20, %21 : vector<8x12xf32>
    %c0_17 = arith.constant 0 : index
    %c0_18 = arith.constant 0 : index
    %23 = vector.load %arg8[%c0_17, %c0_18] : memref<8x12xf32, #tpu.memory_space<vmem>>, vector<8x12xf32>
    tpu.vector_store %arg8[%c0_17, %c0_18], %22 {strides = array<i32>} : memref<8x12xf32, #tpu.memory_space<vmem>>, vector<8x12xf32>,
    return
  }
  func.func @transform_0(%arg0: i32) -> (i32, i32) {
    %c0_i32 = arith.constant 0 : i32
    %c0_i32_0 = arith.constant 0 : i32
    return %arg0, %c0_i32 : i32, i32
  }
  func.func @transform_1(%arg0: i32) -> (i32, i32) {
    %c0_i32 = arith.constant 0 : i32
    %c0_i32_0 = arith.constant 0 : i32
    %c0_i32_1 = arith.constant 0 : i32
    return %c0_i32, %c0_i32_0 : i32, i32
  }
  func.func @transform_2(%arg0: i32) -> (i32, i32) {
    %c0_i32 = arith.constant 0 : i32
    %c0_i32_0 = arith.constant 0 : i32
    %c0_i32_1 = arith.constant 0 : i32
    return %c0_i32, %c0_i32_0 : i32, i32
  }
  func.func @transform_3(%arg0: i32) -> (i32, i32) {
    %c0_i32 = arith.constant 0 : i32
    %c0_i32_0 = arith.constant 0 : i32
    %c0_i32_1 = arith.constant 0 : i32
    return %c0_i32, %c0_i32_0 : i32, i32
  }
  func.func @transform_4(%arg0: i32) -> (i32, i32) {
    %c0_i32 = arith.constant 0 : i32
    %c0_i32_0 = arith.constant 0 : i32
    %c0_i32_1 = arith.constant 0 : i32
    return %c0_i32, %c0_i32_0 : i32, i32
  }
  func.func @transform_5(%arg0: i32) -> (i32, i32) {
    %c0_i32 = arith.constant 0 : i32
    %c0_i32_0 = arith.constant 0 : i32
    %c0_i32_1 = arith.constant 0 : i32
    return %c0_i32, %c0_i32_0 : i32, i32
  }
  func.func @transform_6(%arg0: i32) -> (i32, i32) {
    %c0_i32 = arith.constant 0 : i32
    %c0_i32_0 = arith.constant 0 : i32
    %c0_i32_1 = arith.constant 0 : i32
    return %c0_i32, %c0_i32_0 : i32, i32
  }
  func.func @transform_7(%arg0: i32) -> (i32, i32) {
    %c0_i32 = arith.constant 0 : i32
    %c0_i32_0 = arith.constant 0 : i32
    return %arg0, %c0_i32 : i32, i32
  }
}

</mosaic_0001>

<bundles_post_ra>
// kernel: neural_net_forward.1
= control target key start
LH: loop header
LB: loop body
LE: loop exit
PB: predicated region body
PF: predicated region fallthrough
CT: control target
= control target key end

     0   :  { %vm65_vm0 = vcmask 1045504   ;;  %v374_v0 = vmov 0.0   ;;  %vm66_vm1 = vcmask 1046528   ;;  %v375_v2 = vmov 65535   ;;  %s465_s0 = inlined_call_operand.vmem [shape: f32[8,13], index: 0, kind: input, shape index: {}]   ;;  %s466_s1 = inlined_call_operand.vmem [shape: bf16[13,100], index: 1, kind: input, shape index: {}]   ;;  %s467_s2 = inlined_call_operand.vmem [shape: f32[1,100], index: 2, kind: input, shape index: {}]   ;;  %s468_s3 = inlined_call_operand.vmem [shape: bf16[100,12], index: 3, kind: input, shape index: {}]   ;;  %s469_s4 = inlined_call_operand.vmem [shape: f32[1,12], index: 4, kind: input, shape index: {}]   ;;  %s470_s5 = inlined_call_operand.vmem [shape: bf16[12,12], index: 5, kind: input, shape index: {}]   ;;  %s471_s6 = inlined_call_operand.vmem [shape: f32[1,12], index: 6, kind: input, shape index: {}]   ;;  %s472_s7 = inlined_call_operand.hbm [shape: f32[8,12], index: 7, kind: output, shape index: {}]  }
   0x1   :  { %309 = vmatprep.subr.bf16.mxu0 %v374_v0  ;;  %v343_v1 = vld [vmem:[%s466_s1] sm:$0x7f]   ;;  %315 = vmatprep.subr.bf16.mxu1 %v374_v0  ;;  %v67_v3 = vsel %vm65_vm0, 4294967295, %v375_v2  ;;  %vm376_vm2 = vmmov 0   ;;  %vm163_vm3 = vcmask 1041408   ;;  %vm61_vm4 = vcmask 105472  }
   0x2   :  { %311 = vmatprep.mubr.msk.bf16.mxu0 %vm376_vm2, %v374_v0  ;;  %v48_v4 = vld [vmem:[%s465_s0] sm:$0xff]  ;;  %329 = vmatprep.mubr.msk.bf16.mxu1 %vm376_vm2, %v374_v0  ;;  %v68_v5 = vsel %vm66_vm1, %v67_v3, 0  ;;  %v344_v6 = vld [vmem:[%s468_s3 + $0x30] ss:$0 sps:$4 sm:$0x33]   ;;  %v345_v10 = vld [vmem:[%s468_s3 + $0x28] sm:$0xff]  }
   0x3   :  { %v70_v7 = vand.u32 %v343_v1, %v68_v5  ;;  %v49_v8 = vpack.c.bf16 %v48_v4, %v48_v4  ;;  %v165_v9 = vsel %vm163_vm3, %v344_v6, 0 }
   0x4   :  { %316 = vmatpush3.bf16.msra.mxu1 %v165_v9 }
   0x5   :  { %310 = vmatpush3.bf16.msra.mxu0 %v70_v7  ;;  %317 = vmatprep.subr.bf16.mxu1 %v374_v0 }
   0x6   :  { %333 = vmatprep.subr.bf16.mxu0 %v374_v0 }
   0x8   :  { %312 = vmatmul.mubr.msk.bf16.vlgmr.msra.gmra.mxu0 %vm61_vm4, %v49_v8 }
   0x9   :  { %12 = vsyncpa [#allocation3], 0  ;;  %318 = vmatpush3.bf16.msra.mxu1 %v345_v10  ;;  %v346_v11 = vld [vmem:[%s468_s3 + $0x20] sm:$0xff]   ;;  %335 = vmatprep.mubr.msk.bf16.mxu0 %vm376_vm2, %v374_v0  ;;  %v347_v12 = vld [vmem:[%s468_s3 + $0x18] sm:$0xff]   ;;  %vm159_vm5 = vcmask 818176   ;;  %vm220_vm6 = vcmask 97280  }
   0xa   :  { %319 = vmatprep.subr.bf16.mxu1 %v374_v0  ;;  %v348_v13 = vld [vmem:[%s468_s3 + $0x10] sm:$0xff]   ;;  %v349_v14 = vld [vmem:[%s468_s3 + $0x8] sm:$0xff]   ;;  %v350_v15 = vld [vmem:[%s468_s3] sm:$0xff]   ;;  %s377_s22 = smov [#allocation2]  }
   0xb   :  { %v351_v16 = vld [vmem:[%s470_s5] sm:$0x3f]   ;;  %s274_s23 = sshll.u32 %s377_s22, 4  ;;  %s275_s23 = int_to_ptr.vmem [resolvable:$true] %s274_s23 }
   0xc   :  { %v225_v17 = vsel %vm65_vm0, %v351_v16, 0  ;;  %v282_v18 = vld [vmem:[%s467_s2] ss:$0 sm:$0xff]  ;;  %p357_p1 = scmp.lt.s32.totalorder %s275_s23, %s275_s23 }
   0xd   :  { %320 = vmatpush3.bf16.msra.mxu1 %v346_v11  ;;  %334 = vmatpush3.bf16.msra.mxu0 %v225_v17  ;;  %v285_v26 = vld [vmem:[%s469_s4] ss:$0 sm:$0xff]  ;;  %s352_s4 = scalar_lea.vmem %s275_s23, 128 }
   0xe   :  { %321 = vmatprep.subr.bf16.mxu1 %v374_v0  ;;  %v294_v34 = vld [vmem:[%s471_s6] ss:$0 sm:$0xff]  ;;  %p353_p0 = scmp.ne.s32.totalorder %s275_s23, %s352_s4  ;;  %p358_p2 = scmp.lt.s32.totalorder %s352_s4, %s352_s4 }
  0x10   :  { %p359_p3 = por %p358_p2, %p357_p1 }
  0x11   :  { %322 = vmatpush3.bf16.msra.mxu1 %v347_v12 }
  0x12   :  { %323 = vmatprep.subr.bf16.mxu1 %v374_v0  ;;  %p360_p4 = pnand %p359_p3, %p353_p0 }
  0x15   :  { %324 = vmatpush3.bf16.msra.mxu1 %v348_v13 }
  0x16   :  { %325 = vmatprep.subr.bf16.mxu1 %v374_v0 }
  0x19   :  { %326 = vmatpush3.bf16.msra.mxu1 %v349_v14 }
  0x1a   :  { %327 = vmatprep.subr.bf16.mxu1 %v374_v0 }
  0x1d   :  { %328 = vmatpush3.bf16.msra.mxu1 %v350_v15 }
  0xc8   :  { %v106_v19 = vpop.f32.mrf.mxu0 }
  0xc9   :  { %v107_v20 = vadd.f32 %v282_v18, %v106_v19 }
  0xca   :  { %v313_v21 = vpop.f32.mrf.mxu0 }
  0xcb   :  { %v112_v22 = vmax.f32 %v107_v20, 0.0 }
  0xcc   :  { %v109_v23 = vpop.f32.mrf.mxu0 }
  0xcd   :  { %v113_v24 = vpack.c.bf16 %v112_v22, %v112_v22 }
  0xce   :  { %v314_v25 = vpop.f32.mrf.mxu0 }
  0xcf   :  { %330 = vmatmul.mubr.msk.bf16.vlgmr.msra.gmra.mxu1 %vm159_vm5, %v113_v24 }
 0x18f   :  { %v201_v27 = vpop.f32.mrf.mxu1 }
 0x190   :  { %v202_v28 = vadd.f32 %v285_v26, %v201_v27 }
 0x191   :  { %v331_v29 = vpop.f32.mrf.mxu1 }
 0x192   :  { %v207_v30 = vmax.f32 %v202_v28, 0.0 }
 0x193   :  { %v204_v31 = vpop.f32.mrf.mxu1 }
 0x194   :  { %v208_v32 = vpack.c.bf16 %v207_v30, %v207_v30 }
 0x195   :  { %v332_v33 = vpop.f32.mrf.mxu1 }
 0x196   :  { %336 = vmatmul.mubr.msk.bf16.vlgmr.msra.gmra.mxu0 %vm220_vm6, %v208_v32 }
 0x256   :  { %v261_v35 = vpop.f32.mrf.mxu0 }
 0x257   :  { %v262_v36 = vadd.f32 %v294_v34, %v261_v35 }
 0x258   :  { %v337_v37 = vpop.f32.mrf.mxu0 }
 0x259   :  { %267 = vst.msk [vmem:[#allocation2] sm:$0xff] %vm220_vm6, %v262_v36 }
 0x25a   :  { %v264_v38 = vpop.f32.mrf.mxu0 }
 0x25b   :  { %363 = shalt.err (!%p360_p4)
}
 0x25c   :  { %277 = dma.vmem_to_hbm [thread:$0]  %s275_s23, 128, %s472_s7, [#allocation3]   ;;  %v338_v39 = vpop.f32.mrf.mxu0 }
 0x25d   :  { %372 = dma.done.wait [#allocation3], 128  }
 0x25e   :  { %373 = vsyncadd [#allocation3], 4294967168 }
 0x25f   :  { %281 = vsyncpa [#allocation3], 1 }

</bundles_post_ra>
